<compile_context>
chip_gen: v5e
topology: v5e:2x2
jax: 0.10.0
libtpu: 0.0.40
codegen_flags: <defaults>
</compile_context>

<pallas_src>
import functools

import jax
import jax.numpy as jnp
from jax.experimental import pallas as pl
from jax.experimental.pallas import tpu as pltpu


def _round_up(x, m):
    return ((x + m - 1) // m) * m


def _fused_mlp_kernel(x_ref, *refs, n_layers):
    """Fused MLP over one (1, Cin, TILE_L) activation tile.

    refs = (w_0, b_0, w_1, b_1, ..., w_{n-1}, b_{n-1}, o_ref).
    Each layer:  h <- W_i @ h + b_i  (ReLU between layers, not after the last).
    The length axis stays on the 128-lane dimension; intermediates stay in
    vregs/VMEM (f32 accumulation, f32 epilogue).
    """
    o_ref = refs[-1]
    wb = refs[:-1]
    h = x_ref[0]                                   # (Cin, TILE_L)
    for i in range(n_layers):                      # static unroll (few tiny layers)
        w = wb[2 * i][...]                         # (Cout_i, Cin_i)
        b = wb[2 * i + 1][...]                     # (Cout_i, 1) f32
        h = jnp.dot(w, h.astype(w.dtype), preferred_element_type=jnp.float32)
        h = h + b.astype(jnp.float32)
        if i < n_layers - 1:
            h = jnp.maximum(h, 0.0)
    o_ref[0] = h.astype(o_ref.dtype)


def _choose_tiling(L, max_tile_l, per_lane_bytes, budget_bytes=24 << 20):
    """Pick a lane-dense (multiple-of-128) L tile and the padded L it implies."""
    cap = max(128, min(max_tile_l, budget_bytes // max(per_lane_bytes, 1)))
    cap = (cap // 128) * 128
    L128 = _round_up(L, 128)
    cap = min(cap, L128)
    # Largest multiple-of-128 divisor of L128 that fits under the cap.
    tile_l = 128
    for t in range(cap, 127, -128):
        if L128 % t == 0:
            tile_l = t
            break
    # Ragged L can force tiny divisors (many grid steps); pad further instead.
    if tile_l * 4 < cap:
        tile_l = cap
    L_pad = _round_up(L128, tile_l)
    return tile_l, L_pad


def init_mlp_params(key, ch):
    """Deterministic init matching nn.Conv1d default (kaiming-uniform-ish).

    Weights stored PyTorch-style as (Cout, Cin); bias as (Cout,).
    """
    params = []
    for i in range(len(ch) - 1):
        fan_in = ch[i]
        bound = 1.0 / jnp.sqrt(float(fan_in))
        key, kw, kb = jax.random.split(key, 3)
        w = jax.random.uniform(kw, (ch[i + 1], ch[i]), jnp.float32, -bound, bound)
        b = jax.random.uniform(kb, (ch[i + 1],), jnp.float32, -bound, bound)
        params.append((w, b))
    return params


def mlp_forward(x_ncl, params, *, compute_dtype=jnp.bfloat16, out_dtype=None,
                max_tile_l=8192):
    """x_ncl: (N, C_in, L) like PyTorch Conv1d input. Returns (N, C_out, L).

    compute_dtype: dtype for activations/weights on the MXU (default bf16,
    supported on v5e/v6e/v7x); accumulation + bias/ReLU stay f32.  Pass
    compute_dtype=None for a pure-f32 path.  out_dtype defaults to x dtype.
    """
    N, Cin, L = x_ncl.shape
    n_layers = len(params)
    couts = [w.shape[0] for w, _ in params]
    Cout = couts[-1]
    out_dtype = x_ncl.dtype if out_dtype is None else out_dtype

    x_in = x_ncl if compute_dtype is None else x_ncl.astype(compute_dtype)
    wparams = [((w if compute_dtype is None else w.astype(compute_dtype)), b)
               for (w, b) in params]

    in_isz = jnp.dtype(x_in.dtype).itemsize
    out_isz = jnp.dtype(out_dtype).itemsize
    # Per-lane VMEM footprint (sublane-padded channels, double-buffered I/O,
    # a few f32 intermediates) used to budget the tile size.
    cin_p = _round_up(Cin, 8)
    cout_p = _round_up(Cout, 8)
    cmax_p = _round_up(max([Cin] + couts), 8)
    per_lane_bytes = 2 * cin_p * in_isz + 2 * cout_p * out_isz + 3 * cmax_p * 4

    tile_l, L_pad = _choose_tiling(L, max_tile_l, per_lane_bytes)

    # v7x has 2 TensorCores; make sure the parallel grid has >= 2 points.
    if N * (L_pad // tile_l) < 2 and tile_l % 256 == 0:
        tile_l //= 2

    if L_pad != L:
        x_in = jnp.pad(x_in, ((0, 0), (0, 0), (0, L_pad - L)))

    grid = (N, L_pad // tile_l)

    in_specs = [pl.BlockSpec((1, Cin, tile_l), lambda n, l: (n, 0, l))]
    flat_params = []
    for (w, b) in wparams:
        co, ci = w.shape
        in_specs.append(pl.BlockSpec((co, ci), lambda n, l: (0, 0)))
        in_specs.append(pl.BlockSpec((co, 1), lambda n, l: (0, 0)))
        flat_params += [w, b.astype(jnp.float32).reshape(co, 1)]

    out_specs = pl.BlockSpec((1, Cout, tile_l), lambda n, l: (n, 0, l))

    w_bytes = sum(w.size * jnp.dtype(w.dtype).itemsize + b.shape[0] * 4
                  for w, b in wparams)
    vmem_est = (2 * cin_p * tile_l * in_isz          # double-buffered input tile
                + 2 * cout_p * tile_l * out_isz      # double-buffered output tile
                + 2 * w_bytes                        # double-buffered weights/biases
                + 3 * cmax_p * tile_l * 4)           # f32 working intermediates
    # Headroom, clamped to be safe on every generation (< v7x 64 MiB physical).
    vmem_limit = int(min(max(2 * vmem_est + (4 << 20), 16 << 20), 48 << 20))

    flops = 2 * N * L_pad * sum(w.shape[0] * w.shape[1] for w, _ in wparams)
    bytes_accessed = x_in.size * in_isz + N * L_pad * Cout * out_isz + w_bytes

    out = pl.pallas_call(
        functools.partial(_fused_mlp_kernel, n_layers=n_layers),
        out_shape=jax.ShapeDtypeStruct((N, Cout, L_pad), out_dtype),
        grid=grid,
        in_specs=in_specs,
        out_specs=out_specs,
        compiler_params=pltpu.CompilerParams(
            dimension_semantics=("parallel", "parallel"),
            vmem_limit_bytes=vmem_limit),
        cost_estimate=pl.CostEstimate(
            flops=int(flops), transcendentals=0,
            bytes_accessed=int(bytes_accessed)),
    )(x_in, *flat_params)

    return out[:, :, :L] if L_pad != L else out


def mlp_forward_ref(x_ncl, params):
    """Pure-JAX reference (NCL layout, Conv1d k=1 semantics)."""
    h = x_ncl
    n_layers = len(params)
    for i, (w, b) in enumerate(params):
        h = jnp.einsum("oc,ncl->nol", w, h) + b[None, :, None]
        if i < n_layers - 1:
            h = jnp.maximum(h, 0.0)
    return h


if __name__ == "__main__":
    key = jax.random.PRNGKey(0)
    ch = (4, 32, 32, 8)          # MLP channel spec, use_linear=False (Conv1d k=1)
    N, L = 2, 16                 # batch, sequence length
    kx, kp = jax.random.split(key)
    x = jax.random.normal(kx, (N, ch[0], L), jnp.float32)   # NCL, like PyTorch
    params = init_mlp_params(kp, ch)

    ref = mlp_forward_ref(x, params)

    # Strict-precision path (f32 compute) — bitwise-comparable to the reference.
    out_f32 = jax.block_until_ready(mlp_forward(x, params, compute_dtype=None))
    assert out_f32.shape == (N, ch[-1], L), out_f32.shape
    assert jnp.allclose(out_f32, ref, atol=1e-5, rtol=1e-5), "f32 mismatch vs reference"

    # Default fast path (bf16 compute / f32 accumulate, f32 output).
    out_bf16 = jax.block_until_ready(mlp_forward(x, params))
    assert out_bf16.shape == (N, ch[-1], L), out_bf16.shape
    assert jnp.allclose(out_bf16, ref, atol=5e-2, rtol=5e-2), "bf16 mismatch vs reference"

    print("KERNEL_OK")
</pallas_src>

<mosaic_0001>
module attributes {stable_mosaic.version = 11 : i64} {
  func.func @_fused_mlp_kernel(%arg0: i32, %arg1: i32, %arg2: memref<1x4x128xf32, #tpu.memory_space<vmem>>, %arg3: memref<32x4xf32, #tpu.memory_space<vmem>>, %arg4: memref<32x1xf32, #tpu.memory_space<vmem>>, %arg5: memref<32x32xf32, #tpu.memory_space<vmem>>, %arg6: memref<32x1xf32, #tpu.memory_space<vmem>>, %arg7: memref<8x32xf32, #tpu.memory_space<vmem>>, %arg8: memref<8x1xf32, #tpu.memory_space<vmem>>, %arg9: memref<1x8x128xf32, #tpu.memory_space<vmem>>) attributes {dimension_semantics = [#tpu.dimension_semantics<parallel>, #tpu.dimension_semantics<parallel>], iteration_bounds = array<i64: 2, 1>, scalar_prefetch = 0 : i64, scratch_operands = 0 : i64, tpu.core_type = #tpu.core_type<tc>, window_params = [{transform_indices = @transform_0, window_bounds = array<i64: 1, 4, 128>}, {pipeline_mode = #tpu.pipeline_mode<synchronous>, transform_indices = @transform_1, window_bounds = array<i64: 32, 4>}, {pipeline_mode = #tpu.pipeline_mode<synchronous>, transform_indices = @transform_2, window_bounds = array<i64: 32, 1>}, {pipeline_mode = #tpu.pipeline_mode<synchronous>, transform_indices = @transform_3, window_bounds = array<i64: 32, 32>}, {pipeline_mode = #tpu.pipeline_mode<synchronous>, transform_indices = @transform_4, window_bounds = array<i64: 32, 1>}, {pipeline_mode = #tpu.pipeline_mode<synchronous>, transform_indices = @transform_5, window_bounds = array<i64: 8, 32>}, {pipeline_mode = #tpu.pipeline_mode<synchronous>, transform_indices = @transform_6, window_bounds = array<i64: 8, 1>}, {transform_indices = @transform_7, window_bounds = array<i64: 1, 8, 128>}]} {
    %c0 = arith.constant 0 : index
    %c0_0 = arith.constant 0 : index
    %c0_1 = arith.constant 0 : index
    %0 = vector.load %arg2[%c0, %c0_0, %c0_1] : memref<1x4x128xf32, #tpu.memory_space<vmem>>, vector<1x4x128xf32>
    %1 = vector.shape_cast %0 : vector<1x4x128xf32> to vector<4x128xf32>
    %c0_2 = arith.constant 0 : index
    %c0_3 = arith.constant 0 : index
    %2 = vector.load %arg3[%c0_2, %c0_3] : memref<32x4xf32, #tpu.memory_space<vmem>>, vector<32x4xf32>
    %c0_4 = arith.constant 0 : index
    %c0_5 = arith.constant 0 : index
    %3 = vector.load %arg4[%c0_4, %c0_5] : memref<32x1xf32, #tpu.memory_space<vmem>>, vector<32x1xf32>
    %cst = arith.constant dense<0.000000e+00> : vector<32x128xf32>
    %4 = tpu.matmul %2, %1, %cst {dimension_numbers = #tpu.dot_dimension_numbers<[1], [0], [0], [1], [0, 0, 1, 1], [], []>} : vector<32x4xf32>, vector<4x128xf32>, vector<32x128xf32> -> vector<32x128xf32>
    %5 = vector.broadcast %3 : vector<32x1xf32> to vector<32x128xf32>
    %6 = arith.addf %4, %5 : vector<32x128xf32>
    %cst_6 = arith.constant 0.000000e+00 : f32
    %7 = vector.broadcast %cst_6 : f32 to vector<32x128xf32>
    %8 = arith.maximumf %6, %7 : vector<32x128xf32>
    %c0_7 = arith.constant 0 : index
    %c0_8 = arith.constant 0 : index
    %9 = vector.load %arg5[%c0_7, %c0_8] : memref<32x32xf32, #tpu.memory_space<vmem>>, vector<32x32xf32>
    %c0_9 = arith.constant 0 : index
    %c0_10 = arith.constant 0 : index
    %10 = vector.load %arg6[%c0_9, %c0_10] : memref<32x1xf32, #tpu.memory_space<vmem>>, vector<32x1xf32>
    %cst_11 = arith.constant dense<0.000000e+00> : vector<32x128xf32>
    %11 = tpu.matmul %9, %8, %cst_11 {dimension_numbers = #tpu.dot_dimension_numbers<[1], [0], [0], [1], [0, 0, 1, 1], [], []>} : vector<32x32xf32>, vector<32x128xf32>, vector<32x128xf32> -> vector<32x128xf32>
    %12 = vector.broadcast %10 : vector<32x1xf32> to vector<32x128xf32>
    %13 = arith.addf %11, %12 : vector<32x128xf32>
    %cst_12 = arith.constant 0.000000e+00 : f32
    %14 = vector.broadcast %cst_12 : f32 to vector<32x128xf32>
    %15 = arith.maximumf %13, %14 : vector<32x128xf32>
    %c0_13 = arith.constant 0 : index
    %c0_14 = arith.constant 0 : index
    %16 = vector.load %arg7[%c0_13, %c0_14] : memref<8x32xf32, #tpu.memory_space<vmem>>, vector<8x32xf32>
    %c0_15 = arith.constant 0 : index
    %c0_16 = arith.constant 0 : index
    %17 = vector.load %arg8[%c0_15, %c0_16] : memref<8x1xf32, #tpu.memory_space<vmem>>, vector<8x1xf32>
    %cst_17 = arith.constant dense<0.000000e+00> : vector<8x128xf32>
    %18 = tpu.matmul %16, %15, %cst_17 {dimension_numbers = #tpu.dot_dimension_numbers<[1], [0], [0], [1], [0, 0, 1, 1], [], []>} : vector<8x32xf32>, vector<32x128xf32>, vector<8x128xf32> -> vector<8x128xf32>
    %19 = vector.broadcast %17 : vector<8x1xf32> to vector<8x128xf32>
    %20 = arith.addf %18, %19 : vector<8x128xf32>
    %c0_18 = arith.constant 0 : index
    %c0_19 = arith.constant 0 : index
    %c0_20 = arith.constant 0 : index
    %21 = vector.load %arg9[%c0_18, %c0_19, %c0_20] : memref<1x8x128xf32, #tpu.memory_space<vmem>>, vector<1x8x128xf32>
    %22 = vector.shape_cast %21 : vector<1x8x128xf32> to vector<8x128xf32>
    %23 = vector.shape_cast %20 : vector<8x128xf32> to vector<1x8x128xf32>
    tpu.vector_store %arg9[%c0_18, %c0_19, %c0_20], %23 {strides = array<i32>} : memref<1x8x128xf32, #tpu.memory_space<vmem>>, vector<1x8x128xf32>,
    return
  }
  func.func @transform_0(%arg0: i32, %arg1: i32) -> (i32, i32, i32) {
    %c0_i32 = arith.constant 0 : i32
    %c0_i32_0 = arith.constant 0 : i32
    return %arg0, %c0_i32, %arg1 : i32, i32, i32
  }
  func.func @transform_1(%arg0: i32, %arg1: i32) -> (i32, i32) {
    %c0_i32 = arith.constant 0 : i32
    %c0_i32_0 = arith.constant 0 : i32
    %c0_i32_1 = arith.constant 0 : i32
    return %c0_i32, %c0_i32_0 : i32, i32
  }
  func.func @transform_2(%arg0: i32, %arg1: i32) -> (i32, i32) {
    %c0_i32 = arith.constant 0 : i32
    %c0_i32_0 = arith.constant 0 : i32
    %c0_i32_1 = arith.constant 0 : i32
    return %c0_i32, %c0_i32_0 : i32, i32
  }
  func.func @transform_3(%arg0: i32, %arg1: i32) -> (i32, i32) {
    %c0_i32 = arith.constant 0 : i32
    %c0_i32_0 = arith.constant 0 : i32
    %c0_i32_1 = arith.constant 0 : i32
    return %c0_i32, %c0_i32_0 : i32, i32
  }
  func.func @transform_4(%arg0: i32, %arg1: i32) -> (i32, i32) {
    %c0_i32 = arith.constant 0 : i32
    %c0_i32_0 = arith.constant 0 : i32
    %c0_i32_1 = arith.constant 0 : i32
    return %c0_i32, %c0_i32_0 : i32, i32
  }
  func.func @transform_5(%arg0: i32, %arg1: i32) -> (i32, i32) {
    %c0_i32 = arith.constant 0 : i32
    %c0_i32_0 = arith.constant 0 : i32
    %c0_i32_1 = arith.constant 0 : i32
    return %c0_i32, %c0_i32_0 : i32, i32
  }
  func.func @transform_6(%arg0: i32, %arg1: i32) -> (i32, i32) {
    %c0_i32 = arith.constant 0 : i32
    %c0_i32_0 = arith.constant 0 : i32
    %c0_i32_1 = arith.constant 0 : i32
    return %c0_i32, %c0_i32_0 : i32, i32
  }
  func.func @transform_7(%arg0: i32, %arg1: i32) -> (i32, i32, i32) {
    %c0_i32 = arith.constant 0 : i32
    %c0_i32_0 = arith.constant 0 : i32
    return %arg0, %c0_i32, %arg1 : i32, i32, i32
  }
}

</mosaic_0001>

<bundles_post_ra>
// kernel: tpu_custom_call.1
= control target key start
LH: loop header
LB: loop body
LE: loop exit
PB: predicated region body
PF: predicated region fallthrough
CT: control target
= control target key end

     0   :  { %12 = vsyncpa [#allocation3], 0  ;;  %s937_s0 = inlined_call_operand.vmem [shape: f32[2,4,128], index: 0, kind: input, shape index: {}]   ;;  %s938_s1 = inlined_call_operand.vmem [shape: f32[32,4], index: 1, kind: input, shape index: {}]   ;;  %s939_s2 = inlined_call_operand.vmem [shape: f32[32,1], index: 2, kind: input, shape index: {}]   ;;  %s940_s3 = inlined_call_operand.vmem [shape: f32[32,32], index: 3, kind: input, shape index: {}]   ;;  %s941_s4 = inlined_call_operand.vmem [shape: f32[32,1], index: 4, kind: input, shape index: {}]   ;;  %s942_s5 = inlined_call_operand.vmem [shape: f32[8,32], index: 5, kind: input, shape index: {}]   ;;  %s943_s6 = inlined_call_operand.vmem [shape: f32[8,1], index: 6, kind: input, shape index: {}]   ;;  %s944_s7 = inlined_call_operand.hbm [shape: f32[2,8,128], index: 7, kind: output, shape index: {}]  }
   0x1   :  { %14 = vsyncpa [#allocation3 + $0x1], 0  ;;  %s777_s24 = smov 0   ;;  %s779_s25 = smov 0  }
   0x2   :  { %s781_s26 = smov 0   ;;  %s783_s27 = smov 0  }
   0x3   :  { %s785_s28 = smov 0   ;;  %s787_s29 = smov 0  }
   0x4 LB: > { %s571_s30 = sadd.s32 4294967295, %s734_s29   ;;  %s572_s8 = sadd.s32 4294967294, %s734_s29   ;;  %s734_s29 = sphi %s787_s29, %s20_s29   ;;  %s730_s28 = sphi %s785_s28, %s951_s28   ;;  %s726_s27 = sphi %s783_s27, %s950_s27   ;;  %s722_s26 = sphi %s781_s26, %s949_s26   ;;  %s718_s25 = sphi %s779_s25, %s948_s25   ;;  %s714_s24 = sphi %s777_s24, %s947_s24  }
   0x5   : > { %s32_s9 = sadd.s32 1, %s730_s28  ;;  %s195_s10 = sadd.s32 1, %s722_s26 }
   0x6   : > { %p34_p0 = scmp.ge.s32.totalorder %s32_s9, 2  ;;  %p205_p1 = scmp.ne.s32.totalorder %s722_s26, %s718_s25 }
   0x7   : > { %p206_p2 = scmp.eq.s32.totalorder %s571_s30, 1  ;;  %p211_p3 = scmp.ne.s32.totalorder %s718_s25, %s714_s24 }
   0x8   : > { %s953_s9 = smov (%p34_p0, %s32_s9), 0  ;;  %p212_p5 = scmp.eq.s32.totalorder %s572_s8, 1 }
   0x9   : > { %p817_p4 = por %p206_p2, %p205_p1  ;;  %s190_s12 = ssub.s32 %s730_s28, %s953_s9 }
   0xa   : > { %p575_p6 = scmp.ge.s32.totalorder %s734_s29, 1  ;;  %p193_p7 = scmp.eq.s32.totalorder %s190_s12, 0 }
   0xb   : > { %p824_p8 = por %p212_p5, %p211_p3  ;;  %p258_p9 = scmp.lt.s32.totalorder %s734_s29, 3 }
   0xc   : > { %s830_s14 = scalar_select %p193_p7, %s722_s26, %s195_s10  }
   0xd   : > { %p259_p10 = pnand %p575_p6, %p258_p9 }
   0xe   : > { %p292_p11 = scmp.lt.s32.totalorder (!%p259_p10), %s726_s27, 1  ;;  %s289_s17 = sand.u32 (!%p259_p10), 1, %s718_s25  }
   0xf   : > { %262 = sbr.rel (%p259_p10) target bundleno = 465 (0x1d1), region = 48  ;;  %s576_s18 = sshll.u32 (!%p259_p10), %s289_s17, 3 }
  0x10   : > { %s484_s10 = scalar_lea.sflag (!%p259_p10), [#allocation3], %s289_s17 }
  0x14   : > { %v736_v0 = vmov 0   ;;  %v307_v1 = vld [vmem:[%s939_s2 + $0x18] sm:$0xff]  ;;  %v305_v2 = vld [vmem:[%s939_s2 + $0x8] sm:$0xff]  ;;  %s293_s19 = scalar_select %p292_p11, %s726_s27, 1  ;;  %vm341_vm0 = vcmask 1043456   ;;  %v300_v3 = vld [vmem:[%s938_s1] sm:$0xff] }
  0x15   : > { %654 = vset.pattern.permute.xlu1 %v736_v0  ;;  %653 = vset.pattern.permute.xlu0 %v736_v0  ;;  %vm328_vm1 = vcmask 31744   ;;  %v303_v4 = vld [vmem:[%s938_s1 + $0x18] sm:$0xff]  ;;  %v306_v6 = vld [vmem:[%s939_s2 + $0x10] sm:$0xff]  ;;  %v304_v7 = vld [vmem:[%s939_s2] sm:$0xff]  ;;  %vm406_vm2 = vcmask 261120  }
  0x16   : > { %325 = vperm.xlu0 %653, %v307_v1   ;;  %315 = vperm.xlu1 %654, %v305_v2   ;;  %s577_s20 = sshll.u32 %s293_s19, 2  ;;  %v301_v8 = vld [vmem:[%s938_s1 + $0x8] sm:$0xff]  ;;  %v382_v10 = vld [vmem:[%s941_s4] sm:$0xff]  ;;  %v302_v11 = vld [vmem:[%s938_s1 + $0x10] sm:$0xff]  ;;  %s589_s19 = sshll.u32 %s726_s27, 3 }
  0x17   : > { %655 = vset.pattern.permute.xlu2 %v736_v0  ;;  %s298_s23 = scalar_lea.vmem %s937_s0, %s577_s20  ;;  %v383_v9 = vld [vmem:[%s941_s4 + $0x8] sm:$0xff]  ;;  %v385_v13 = vld [vmem:[%s941_s4 + $0x18] sm:$0xff]  ;;  %v384_v20 = vld [vmem:[%s941_s4 + $0x10] sm:$0xff]  ;;  %s495_s22 = scalar_lea.hbm %s944_s7, %s589_s19 }
  0x18   : > { %v299_v5 = vld [vmem:[%s298_s23] sm:$0xf]  ;;  %403 = vperm.xlu2 %655, %v385_v13   ;;  %v380_v32 = vld [vmem:[%s940_s3 + $0x10] sm:$0xff]  ;;  %v379_v33 = vld [vmem:[%s940_s3 + $0x8] sm:$0xff]  ;;  %s291_s23 = scalar_lea.vmem [#allocation2], %s576_s18  ;;  %s499_s8 = sshll.u32 %s495_s22, 4  ;;  %s500_s8 = int_to_ptr.hbm [resolvable:$true] %s499_s8 }
  0x19   : > { %578 = vmatpush.msk.msra.mxu0 %vm341_vm0, %v299_v5  ;;  %592 = vmatpush.msk.msra.mxu2 %vm341_vm0, %v299_v5  ;;  %v453_v26 = vld [vmem:[%s943_s6] sm:$0xff]  ;;  %v381_v34 = vld [vmem:[%s940_s3 + $0x18] sm:$0xff]  ;;  %s497_s30 = sshll.u32 %s291_s23, 4  ;;  %s670_s12 = sshra.s32 %s500_s8, 4  ;;  %s498_s30 = int_to_ptr.vmem [resolvable:$true] %s497_s30  ;;  %s671_s12 = int_to_ptr.hbm [resolvable:$true] %s670_s12 }
  0x1a   : > { %579 = vmatmul.msk.f32.vlgmr.msra.gmra.mxu0 %vm328_vm1, %v300_v3  ;;  %582 = vmatmul.msk.f32.vlgmr.msra.gmra.mxu2 %vm328_vm1, %v303_v4  ;;  %v378_v31 = vld [vmem:[%s940_s3] sm:$0xff]  ;;  %s672_s15 = scalar_lea.hbm %s671_s12, 8  ;;  %s676_s18 = scalar_lea.hbm %s944_s7, 16 }
  0x1b   : > { %v452_v51 = vld [vmem:[%s942_s5] sm:$0xff]  ;;  %p673_p12 = scmp.ne.s32.totalorder %s671_s12, %s672_s15  ;;  %p677_p1 = scmp.lt.s32.totalorder %s671_s12, %s944_s7 }
  0x1c   : > { %p678_p2 = scmp.lt.s32.totalorder %s676_s18, %s672_s15 }
  0x1d   : > { %p674_p13 = pnand %p673_p12, %p817_p4 }
  0x1e   : > { %320 = vperm.xlu0 %653, %v306_v6   ;;  %310 = vperm.xlu1 %654, %v304_v7   ;;  %p679_p3 = por %p678_p2, %p677_p1 }
  0x1f   : > { %p675_p0 = pneg %p674_p13 }
  0x20   : > { %398 = vperm.xlu2 %655, %v384_v20  }
  0x21   : > { %p680_p5 = pnand %p679_p3, %p675_p0 }
  0x22   : > { %580 = vmatmul.msk.f32.gmra.mxu0 %vm328_vm1, %v301_v8 }
  0x26   : > { %393 = vperm.xlu0 %653, %v383_v9   ;;  %388 = vperm.xlu1 %654, %v382_v10  }
  0x28   : > { %456 = vperm.xlu2 %655, %v453_v26  }
  0x2a   : > { %581 = vmatmul.msk.f32.gmra.mxu0 %vm328_vm1, %v302_v11 }
  0x72   : > { %v404_v35 = vpop.permute.xlu2 %403 }
  0x7a   : > { %v399_v38 = vpop.permute.xlu2 %398 }
  0x82   : > { %v457_v52 = vpop.permute.xlu2 %456 }
  0x88   : > { %v326_v14 = vpop.permute.xlu0 %325  ;;  %v316_v15 = vpop.permute.xlu1 %315 }
  0x90   : > { %v321_v21 = vpop.permute.xlu0 %320  ;;  %v311_v22 = vpop.permute.xlu1 %310 }
  0x97   : > { %v362_v12 = vpop.f32.mrf.mxu0 }
  0x98   : > { %v363_v27 = vadd.f32 %v362_v12, %v311_v22  ;;  %v394_v43 = vpop.permute.xlu0 %393  ;;  %v389_v46 = vpop.permute.xlu1 %388 }
  0x9a   : > { %v374_v30 = vmax.f32 %v363_v27, 0.0 }
  0x9d   : > { %v371_v16 = vpop.f32.mrf.mxu2 }
  0x9e   : > { %v372_v17 = vadd.f32 %v371_v16, %v326_v14 }
  0x9f   : > { %v365_v18 = vpop.f32.mrf.mxu0 }
  0xa0   : > { %v377_v19 = vmax.f32 %v372_v17, 0.0  ;;  %v366_v24 = vadd.f32 %v365_v18, %v316_v15 }
  0xa2   : > { %431 = vmatpush.msra.mxu1 %v377_v19  ;;  %593 = vmatpush.msra.mxu3 %v377_v19  ;;  %v375_v29 = vmax.f32 %v366_v24, 0.0 }
  0xa7   : > { %v368_v23 = vpop.f32.mrf.mxu0 }
  0xa8   : > { %v369_v25 = vadd.f32 %v368_v23, %v321_v21 }
  0xaa   : > { %v376_v28 = vmax.f32 %v369_v25, 0.0 }
  0xac   : > { %432 = vmatpush.msra.mxu1 %v376_v28  ;;  %594 = vmatpush.msra.mxu3 %v376_v28 }
  0xae   : > { %433 = vmatpush.msra.mxu1 %v375_v29  ;;  %595 = vmatpush.msra.mxu3 %v375_v29 }
  0xb0   : > { %434 = vmatpush.msra.mxu1 %v374_v30  ;;  %596 = vmatpush.msra.mxu3 %v374_v30 }
  0xb1   : > { %583 = vmatmul.msk.f32.vlgmr.msra.gmra.mxu1 %vm406_vm2, %v378_v31  ;;  %585 = vmatmul.msk.f32.vlgmr.msra.gmra.mxu3 %vm406_vm2, %v380_v32 }
  0xb9   : > { %584 = vmatmul.msk.f32.gmra.mxu1 %vm406_vm2, %v379_v33  ;;  %586 = vmatmul.msk.f32.gmra.mxu3 %vm406_vm2, %v381_v34 }
 0x12e   : > { %v436_v36 = vpop.f32.mrf.mxu1 }
 0x12f   : > { %v437_v47 = vadd.f32 %v436_v36, %v389_v46 }
 0x131   : > { %v448_v50 = vmax.f32 %v437_v47, 0.0 }
 0x134   : > { %v442_v37 = vpop.f32.mrf.mxu3 }
 0x135   : > { %v443_v41 = vadd.f32 %v442_v37, %v399_v38 }
 0x136   : > { %v439_v39 = vpop.f32.mrf.mxu1 }
 0x137   : > { %v440_v44 = vadd.f32 %v439_v39, %v394_v43  ;;  %v450_v48 = vmax.f32 %v443_v41, 0.0 }
 0x139   : > { %v449_v49 = vmax.f32 %v440_v44, 0.0 }
 0x13c   : > { %v445_v40 = vpop.f32.mrf.mxu3 }
 0x13d   : > { %v446_v42 = vadd.f32 %v445_v40, %v404_v35 }
 0x13f   : > { %v451_v45 = vmax.f32 %v446_v42, 0.0 }
 0x141   : > { %474 = vmatpush.msrb.mxu2 %v451_v45 }
 0x143   : > { %475 = vmatpush.msrb.mxu2 %v450_v48 }
 0x145   : > { %476 = vmatpush.msrb.mxu2 %v449_v49 }
 0x147   : > { %477 = vmatpush.msrb.mxu2 %v448_v50 }
 0x148   : > { %587 = vmatmul.msk.f32.vlgmr.msrb.gmra.mxu2 %vm406_vm2, %v452_v51 }
 0x1cb   : > { %v479_v53 = vpop.f32.mrf.mxu2 }
 0x1cc   : > { %v480_v54 = vadd.f32 %v479_v53, %v457_v52 }
 0x1ce   : > { %482 = vst [vmem:[%s291_s23] sm:$0xff] %v480_v54 }
 0x1cf   : > { %683 = shalt.err (!%p680_p5)
}
 0x1d0   : > { %597 = dma.vmem_to_hbm [thread:$0]  (%p817_p4), %s498_s30, 128, %s500_s8, %s484_s10  }
 0x1d1 PF: > { %p603_p6 = scmp.ge.s32.totalorder %s734_s29, 2  ;;  %s511_s17 = sand.u32 1, %s714_s24  }
 0x1d2   : > { %s512_s21 = scalar_lea.sflag [#allocation3], %s511_s17 }
 0x1d3   : > { %p600_p7 = pnand %p603_p6, %p824_p8 }
 0x1d5   : > { %p601_p9 = pneg %p600_p7 }
 0x1d7   : > { %709 = dma.done.wait (%p601_p9), %s512_s21, 128  }
 0x1d8   : > { %711 = vsyncadd (%p601_p9), %s512_s21, 4294967168  ;;  %s20_s29 = sadd.s32 1, %s734_s29   ;;  %s947_s24 = smov %s718_s25 }
 0x1d9   : > { %p17_p10 = scmp.ge.s32.totalorder %s20_s29, 4   ;;  %s948_s25 = smov %s722_s26 }
 0x1da   : > { %s949_s26 = smov %s830_s14  ;;  %s950_s27 = smov %s730_s28 }
 0x1db   : > { %s951_s28 = smov %s953_s9  ;;  %19 = sbr.rel (!%p17_p10) target bundleno = 4 (0x4), region = 83 }
 0x1e0   :  { %518 = vsyncpa [#allocation3], 1 }
 0x1e1   :  { %520 = vsyncpa [#allocation3 + $0x1], 1 }

</bundles_post_ra>
